<compile_context>
chip_gen: v7x
topology: tpu7x:2x2x1
jax: 0.10.0
libtpu: 0.0.40
codegen_flags: <defaults>
</compile_context>

<pallas_src>
import functools

import jax
import jax.numpy as jnp
from jax.experimental import pallas as pl
from jax.experimental.pallas import tpu as pltpu

_LANE = 128


def _round_up(x: int, m: int) -> int:
    return (x + m - 1) // m * m


def _sublane_multiple(dtype) -> int:
    itemsize = jnp.dtype(dtype).itemsize
    return {4: 8, 2: 16, 1: 32}.get(itemsize, 8)


# ----------------------------------------------------------------------------
# Kernel: one (tm, tn) output tile, accumulated over the K grid axis.
# ----------------------------------------------------------------------------
def block_kernel(x_ref, w_ref, b_ref, o_ref, acc_ref):
    # x_ref: (tm, tk)   w_ref: (tk, tn)   b_ref: (1, tn) f32
    # o_ref: (tm, tn)   acc_ref: (tm, tn) f32 scratch
    k = pl.program_id(2)

    @pl.when(k == 0)
    def _():
        acc_ref[...] = jnp.zeros_like(acc_ref)

    acc_ref[...] += jnp.dot(x_ref[...], w_ref[...],
                            preferred_element_type=jnp.float32)

    @pl.when(k == pl.num_programs(2) - 1)
    def _():
        # bias-add + ReLU epilogue in f32 on the VPU.
        o_ref[...] = jnp.maximum(acc_ref[...] + b_ref[...], 0.0).astype(o_ref.dtype)


# ----------------------------------------------------------------------------
# One-time parameter prep (do NOT call per step in a real model).
# ----------------------------------------------------------------------------
def prepare_block_params(weight, bias, compute_dtype=None):
    """Transpose weight to (K, N) and zero-pad to lane-dense multiples of 128.

    weight: (out_dim, in_dim)   [PyTorch nn.Linear layout]
    bias:   (out_dim,)
    compute_dtype: e.g. jnp.bfloat16 for the MXU inputs on v6e/v7x/v5e.
    Returns (wt (K, N) in compute_dtype, bias2d (1, N) f32).
    """
    out_dim, in_dim = weight.shape
    K = _round_up(in_dim, _LANE)
    N = _round_up(out_dim, _LANE)
    wdt = compute_dtype or weight.dtype
    wt = jnp.zeros((K, N), wdt).at[:in_dim, :out_dim].set(weight.T.astype(wdt))
    b2 = jnp.zeros((1, N), jnp.float32).at[:, :out_dim].set(bias.astype(jnp.float32))
    return wt, b2


# ----------------------------------------------------------------------------
# Tile selection against an explicit VMEM budget.
# ----------------------------------------------------------------------------
_VMEM_BUDGET = 24 * 1024 * 1024  # conservative for v7x (64 MiB phys / 32 scoped)


def _vmem_usage(tm, tn, tk, x_bytes, w_bytes, o_bytes):
    return (2 * tm * tk * x_bytes        # x tile, double-buffered
            + 2 * tk * tn * w_bytes      # weight tile, double-buffered
            + 2 * tm * tn * o_bytes      # out tile, double-buffered
            + tm * tn * 4                # f32 accumulator scratch
            + 2 * tn * 4)                # bias tile


def _largest_dividing_tile(total, align, pred):
    """Largest multiple of `align` that divides `total` and satisfies pred."""
    best = align
    for d in range(1, total // align + 1):
        cand = align * d
        if total % cand == 0 and pred(cand):
            best = cand
    return best


# ----------------------------------------------------------------------------
# Forward: relu(x @ W^T + b) with pre-prepared (padded, transposed) params.
# ----------------------------------------------------------------------------
@functools.partial(jax.jit, static_argnames=("out_dim", "block_b"))
def block_apply(x, wt, b2, *, out_dim, block_b=256):
    B, in_dim = x.shape
    K, N = wt.shape
    compute_dtype = wt.dtype
    out_dtype = x.dtype

    x_bytes = jnp.dtype(compute_dtype).itemsize
    w_bytes = jnp.dtype(compute_dtype).itemsize
    o_bytes = jnp.dtype(out_dtype).itemsize

    # --- tile sizes -----------------------------------------------------------
    sub = _sublane_multiple(compute_dtype)          # 8 for f32, 16 for bf16
    tm = min(block_b, _round_up(max(B, 1), sub))
    Bp = _round_up(B, tm)                           # tm divides Bp by construction

    tn = _largest_dividing_tile(N, _LANE, lambda t: t <= 512)
    tk = _largest_dividing_tile(
        K, _LANE, lambda t: _vmem_usage(tm, tn, t, x_bytes, w_bytes, o_bytes)
        <= _VMEM_BUDGET)

    est = _vmem_usage(tm, tn, tk, x_bytes, w_bytes, o_bytes)
    vmem_limit = int(min(max(2 * est, 32 * 1024 * 1024), 56 * 1024 * 1024))

    # --- pad / cast input only when needed (static Python check) -------------
    need_pad = (B != Bp) or (in_dim != K)
    if need_pad:
        xp = jnp.zeros((Bp, K), compute_dtype).at[:B, :in_dim].set(
            x.astype(compute_dtype))
    else:
        xp = x.astype(compute_dtype) if x.dtype != compute_dtype else x

    grid = (Bp // tm, N // tn, K // tk)

    cost = pl.CostEstimate(
        flops=2 * Bp * K * N,
        transcendentals=0,
        bytes_accessed=(Bp * K * x_bytes
                        + (Bp // tm) * K * N * w_bytes   # weight re-read per batch tile
                        + N * 4
                        + Bp * N * o_bytes),
    )

    out = pl.pallas_call(
        block_kernel,
        out_shape=jax.ShapeDtypeStruct((Bp, N), out_dtype),
        grid_spec=pltpu.PrefetchScalarGridSpec(
            num_scalar_prefetch=0,
            grid=grid,
            in_specs=[
                pl.BlockSpec((tm, tk), lambda i, j, k: (i, k)),   # x tile
                pl.BlockSpec((tk, tn), lambda i, j, k: (k, j)),   # weight tile
                pl.BlockSpec((1, tn), lambda i, j, k: (0, j)),    # bias tile
            ],
            out_specs=pl.BlockSpec((tm, tn), lambda i, j, k: (i, j)),
            scratch_shapes=[pltpu.VMEM((tm, tn), jnp.float32)],
        ),
        compiler_params=pltpu.CompilerParams(
            dimension_semantics=("parallel", "parallel", "arbitrary"),
            vmem_limit_bytes=vmem_limit,
        ),
        cost_estimate=cost,
    )(xp, wt, b2)

    # Strip padding only when it was added.
    if Bp != B or N != out_dim:
        out = out[:B, :out_dim]
    return out


def block_forward(x, weight, bias, compute_dtype=None):
    """Matches Block.forward(x) with PyTorch-layout params (weight (out, in))."""
    wt, b2 = prepare_block_params(weight, bias, compute_dtype)  # do once in practice
    return block_apply(x, wt, b2, out_dim=weight.shape[0])


if __name__ == "__main__":
    key = jax.random.PRNGKey(0)

    # --- small shape consistent with Block(in_dim, out_dim) ------------------
    B, in_dim, out_dim = 8, 32, 16
    kx, kw, kb = jax.random.split(key, 3)
    x = jax.random.normal(kx, (B, in_dim), dtype=jnp.float32)
    bound = 1.0 / jnp.sqrt(jnp.float32(in_dim))
    weight = jax.random.uniform(kw, (out_dim, in_dim), jnp.float32, -bound, bound)
    bias = jax.random.uniform(kb, (out_dim,), jnp.float32, -bound, bound)

    ref = jnp.maximum(x @ weight.T + bias, 0.0)

    # f32 MXU path (tight tolerance).
    out = jax.block_until_ready(block_forward(x, weight, bias))
    assert out.shape == (B, out_dim)
    assert jnp.allclose(out, ref, atol=1e-5, rtol=1e-5)

    # bf16 MXU-input path (recommended on v6e/v7x/v5e); f32 accumulate + epilogue.
    out_bf16 = jax.block_until_ready(
        block_forward(x, weight, bias, compute_dtype=jnp.bfloat16))
    assert out_bf16.shape == (B, out_dim)
    assert jnp.allclose(out_bf16, ref, atol=2e-2, rtol=2e-2)

    # --- second case exercising padding + multi-tile N/K ---------------------
    B2, in2, out2 = 50, 300, 200
    k2x, k2w, k2b = jax.random.split(jax.random.PRNGKey(1), 3)
    x2 = jax.random.normal(k2x, (B2, in2), dtype=jnp.float32)
    bound2 = 1.0 / jnp.sqrt(jnp.float32(in2))
    w2 = jax.random.uniform(k2w, (out2, in2), jnp.float32, -bound2, bound2)
    b2_ = jax.random.uniform(k2b, (out2,), jnp.float32, -bound2, bound2)
    out2_ = jax.block_until_ready(block_forward(x2, w2, b2_))
    ref2 = jnp.maximum(x2 @ w2.T + b2_, 0.0)
    assert out2_.shape == (B2, out2)
    assert jnp.allclose(out2_, ref2, atol=1e-4, rtol=1e-4)

    print("KERNEL_OK")
</pallas_src>

<mosaic_0001>
module attributes {stable_mosaic.version = 11 : i64} {
  func.func @block_kernel(%arg0: i32, %arg1: i32, %arg2: i32, %arg3: memref<8x128xf32, #tpu.memory_space<vmem>>, %arg4: memref<128x128xf32, #tpu.memory_space<vmem>>, %arg5: memref<1x128xf32, #tpu.memory_space<vmem>>, %arg6: memref<8x128xf32, #tpu.memory_space<vmem>>, %arg7: memref<8x128xf32, #tpu.memory_space<vmem>>) attributes {dimension_semantics = [#tpu.dimension_semantics<parallel>, #tpu.dimension_semantics<parallel>, #tpu.dimension_semantics<arbitrary>], iteration_bounds = array<i64: 1, 1, 1>, scalar_prefetch = 0 : i64, scratch_operands = 1 : i64, tpu.core_type = #tpu.core_type<tc>, window_params = [{transform_indices = @transform_0, window_bounds = array<i64: 8, 128>}, {transform_indices = @transform_1, window_bounds = array<i64: 128, 128>}, {transform_indices = @transform_2, window_bounds = array<i64: 1, 128>}, {transform_indices = @transform_3, window_bounds = array<i64: 8, 128>}]} {
    %c0_i32 = arith.constant 0 : i32
    %0 = arith.cmpi eq, %arg2, %c0_i32 : i32
    %1 = arith.extui %0 : i1 to i32
    %c0_i32_0 = arith.constant 0 : i32
    %2 = arith.cmpi ne, %1, %c0_i32_0 : i32
    scf.if %2 {
      %cst_10 = arith.constant 0.000000e+00 : f32
      %12 = vector.broadcast %cst_10 : f32 to vector<8x128xf32>
      %c0_11 = arith.constant 0 : index
      %c0_12 = arith.constant 0 : index
      %13 = vector.load %arg7[%c0_11, %c0_12] : memref<8x128xf32, #tpu.memory_space<vmem>>, vector<8x128xf32>
      tpu.vector_store %arg7[%c0_11, %c0_12], %12 {strides = array<i32>} : memref<8x128xf32, #tpu.memory_space<vmem>>, vector<8x128xf32>,
    } else {
    }
    %c0 = arith.constant 0 : index
    %c0_1 = arith.constant 0 : index
    %3 = vector.load %arg7[%c0, %c0_1] : memref<8x128xf32, #tpu.memory_space<vmem>>, vector<8x128xf32>
    %c0_2 = arith.constant 0 : index
    %c0_3 = arith.constant 0 : index
    %4 = vector.load %arg3[%c0_2, %c0_3] : memref<8x128xf32, #tpu.memory_space<vmem>>, vector<8x128xf32>
    %c0_4 = arith.constant 0 : index
    %c0_5 = arith.constant 0 : index
    %5 = vector.load %arg4[%c0_4, %c0_5] : memref<128x128xf32, #tpu.memory_space<vmem>>, vector<128x128xf32>
    %cst = arith.constant dense<0.000000e+00> : vector<8x128xf32>
    %6 = tpu.matmul %4, %5, %cst {dimension_numbers = #tpu.dot_dimension_numbers<[1], [0], [0], [1], [0, 0, 1, 1], [], []>} : vector<8x128xf32>, vector<128x128xf32>, vector<8x128xf32> -> vector<8x128xf32>
    %7 = arith.addf %3, %6 : vector<8x128xf32>
    %c0_6 = arith.constant 0 : index
    %c0_7 = arith.constant 0 : index
    %8 = vector.load %arg7[%c0_6, %c0_7] : memref<8x128xf32, #tpu.memory_space<vmem>>, vector<8x128xf32>
    tpu.vector_store %arg7[%c0_6, %c0_7], %7 {strides = array<i32>} : memref<8x128xf32, #tpu.memory_space<vmem>>, vector<8x128xf32>,
    %c0_i32_8 = arith.constant 0 : i32
    %9 = arith.cmpi eq, %arg2, %c0_i32_8 : i32
    %10 = arith.extui %9 : i1 to i32
    %c0_i32_9 = arith.constant 0 : i32
    %11 = arith.cmpi ne, %10, %c0_i32_9 : i32
    scf.if %11 {
      %c0_10 = arith.constant 0 : index
      %c0_11 = arith.constant 0 : index
      %12 = vector.load %arg7[%c0_10, %c0_11] : memref<8x128xf32, #tpu.memory_space<vmem>>, vector<8x128xf32>
      %c0_12 = arith.constant 0 : index
      %c0_13 = arith.constant 0 : index
      %13 = vector.load %arg5[%c0_12, %c0_13] : memref<1x128xf32, #tpu.memory_space<vmem>>, vector<1x128xf32>
      %14 = vector.broadcast %13 : vector<1x128xf32> to vector<8x128xf32>
      %15 = arith.addf %12, %14 : vector<8x128xf32>
      %cst_14 = arith.constant 0.000000e+00 : f32
      %16 = vector.broadcast %cst_14 : f32 to vector<8x128xf32>
      %17 = arith.maximumf %15, %16 : vector<8x128xf32>
      %c0_15 = arith.constant 0 : index
      %c0_16 = arith.constant 0 : index
      %18 = vector.load %arg6[%c0_15, %c0_16] : memref<8x128xf32, #tpu.memory_space<vmem>>, vector<8x128xf32>
      tpu.vector_store %arg6[%c0_15, %c0_16], %17 {strides = array<i32>} : memref<8x128xf32, #tpu.memory_space<vmem>>, vector<8x128xf32>,
    } else {
    }
    return
  }
  func.func @transform_0(%arg0: i32, %arg1: i32, %arg2: i32) -> (i32, i32) {
    %c0_i32 = arith.constant 0 : i32
    return %arg0, %arg2 : i32, i32
  }
  func.func @transform_1(%arg0: i32, %arg1: i32, %arg2: i32) -> (i32, i32) {
    %c0_i32 = arith.constant 0 : i32
    return %arg2, %arg1 : i32, i32
  }
  func.func @transform_2(%arg0: i32, %arg1: i32, %arg2: i32) -> (i32, i32) {
    %c0_i32 = arith.constant 0 : i32
    %c0_i32_0 = arith.constant 0 : i32
    return %c0_i32, %arg1 : i32, i32
  }
  func.func @transform_3(%arg0: i32, %arg1: i32, %arg2: i32) -> (i32, i32) {
    %c0_i32 = arith.constant 0 : i32
    return %arg0, %arg1 : i32, i32
  }
}

</mosaic_0001>

<bundles_post_ra>
// kernel: block_apply.1
= control target key start
LH: loop header
LB: loop body
LE: loop exit
PB: predicated region body
PF: predicated region fallthrough
CT: control target
= control target key end

     0   :  { %8 = vsyncpa [#allocation4], 0  ;;  %s342_s0 = inlined_call_operand.vmem [shape: f32[8,128], index: 0, kind: input, shape index: {}]   ;;  %s343_s1 = inlined_call_operand.hbm [shape: f32[128,128], index: 1, kind: input, shape index: {}]   ;;  %s344_s2 = inlined_call_operand.vmem [shape: f32[1,128], index: 2, kind: input, shape index: {}]   ;;  %s345_s3 = inlined_call_operand.hbm [shape: f32[8,128], index: 3, kind: output, shape index: {}]  }
   0x1   :  { %9 = vsyncpa [#allocation5], 0  ;;  %s285_s12 = smov [#allocation3]   ;;  %s237_s16 = scalar_lea.hbm %s343_s1, 2048 }
   0x2   :  { %s17_s13 = sshll.u32 %s285_s12, 4  ;;  %p238_p0 = scmp.ne.s32.totalorder %s343_s1, %s237_s16  ;;  %s18_s13 = int_to_ptr.vmem [resolvable:$true] %s17_s13 }
   0x3   :  { %p241_p1 = scmp.lt.u32.totalorder %s237_s16, %s343_s1 }
   0x5   :  { %p243_p2 = pnand %p241_p1, %p238_p0 }
   0x7   :  { %246 = shalt.err (!%p243_p2)
}
   0x8   :  { %s247_s21 = scalar_lea.vmem %s18_s13, 2048  ;;  %p252_p4 = scmp.lt.s32.totalorder %s18_s13, %s18_s13 }
   0x9   :  { %p248_p3 = scmp.ne.s32.totalorder %s18_s13, %s247_s21  ;;  %p253_p5 = scmp.lt.s32.totalorder %s247_s21, %s247_s21 }
   0xb   :  { %p254_p6 = por %p253_p5, %p252_p4 }
   0xd   :  { %p255_p7 = pnand %p254_p6, %p248_p3 }
   0xf   :  { %258 = shalt.err (!%p255_p7)
}
  0x10   :  { %s286_s22 = smov 128   ;;  %s287_s23 = smov 8  }
  0x11   :  { %23 = dma.hbm_to_vmem [thread:$0]  %s343_s1, 2048, %s18_s13, [#allocation4], %s286_s22, %s286_s22, %s287_s23  }
  0x12   :  { %281 = dma.done.wait [#allocation4], 2048  }
  0x13   :  { %282 = vsyncadd [#allocation4], 4294965248  ;;  %v288_v0 = vmov 0.0|0.0   ;;  %vm289_vm0 = vmmov 0   ;;  %v290_v1 = vmov 0.0   ;;  %v36_v2 = vld [vmem:[#allocation3] sm:$0xff] }
  0x14   :  { %206 = vmatprep.subr.bf16.mxu0 %v288_v0  ;;  %203 = vmatprep.mubr.msk.f32.mxu0 %vm289_vm0, %v290_v1  ;;  %v37_v3 = vld [vmem:[#allocation3 + $0x8] sm:$0xff]  ;;  %v38_v4 = vld [vmem:[#allocation3 + $0x10] sm:$0xff]  ;;  %v39_v6 = vld [vmem:[#allocation3 + $0x18] sm:$0xff]  ;;  %s291_s29 = smov [#allocation6]  }
  0x15   :  { %v207_v5 = vpack.c.bf16 %v37_v3, %v36_v2  ;;  %v210_v7 = vpack.c.bf16 %v39_v6, %v38_v4  ;;  %v40_v8 = vld [vmem:[#allocation3 + $0x20] sm:$0xff]  ;;  %v41_v9 = vld [vmem:[#allocation3 + $0x28] sm:$0xff]  ;;  %v42_v11 = vld [vmem:[#allocation3 + $0x30] sm:$0xff]  ;;  %s144_s30 = sshll.u32 %s291_s29, 4  ;;  %s145_s30 = int_to_ptr.vmem [resolvable:$true] %s144_s30 }
  0x16   :  { %v213_v10 = vpack.c.bf16 %v41_v9, %v40_v8  ;;  %v43_v12 = vld [vmem:[#allocation3 + $0x38] sm:$0xff]  ;;  %v44_v14 = vld [vmem:[#allocation3 + $0x40] sm:$0xff]  ;;  %v45_v15 = vld [vmem:[#allocation3 + $0x48] sm:$0xff]  ;;  %s259_s4 = scalar_lea.vmem %s145_s30, 128  ;;  %p264_p9 = scmp.lt.s32.totalorder %s145_s30, %s145_s30 }
  0x17   :  { %208 = vmatpush3.bf16.msra.mxu0 %v207_v5  ;;  %v216_v13 = vpack.c.bf16 %v43_v12, %v42_v11  ;;  %v219_v16 = vpack.c.bf16 %v45_v15, %v44_v14  ;;  %v46_v17 = vld [vmem:[#allocation3 + $0x50] sm:$0xff]  ;;  %v47_v18 = vld [vmem:[#allocation3 + $0x58] sm:$0xff]  ;;  %v48_v20 = vld [vmem:[#allocation3 + $0x60] sm:$0xff]  ;;  %p260_p8 = scmp.ne.s32.totalorder %s145_s30, %s259_s4  ;;  %p265_p10 = scmp.lt.s32.totalorder %s259_s4, %s259_s4 }
  0x18   :  { %209 = vmatprep.subr.bf16.mxu0 %v288_v0  ;;  %v222_v19 = vpack.c.bf16 %v47_v18, %v46_v17  ;;  %v49_v21 = vld [vmem:[#allocation3 + $0x68] sm:$0xff]  ;;  %v50_v23 = vld [vmem:[#allocation3 + $0x70] sm:$0xff]  ;;  %v51_v24 = vld [vmem:[#allocation3 + $0x78] sm:$0xff] }
  0x19   :  { %v225_v22 = vpack.c.bf16 %v49_v21, %v48_v20  ;;  %v228_v25 = vpack.c.bf16 %v51_v24, %v50_v23  ;;  %v35_v26 = vld [vmem:[%s342_s0] sm:$0xff]  ;;  %p266_p11 = por %p265_p10, %p264_p9 }
  0x1a   :  { %v153_v27 = vld [vmem:[%s344_s2] ss:$0 sm:$0xff] }
  0x1b   :  { %211 = vmatpush3.bf16.msra.mxu0 %v210_v7  ;;  %p267_p12 = pnand %p266_p11, %p260_p8 }
  0x1c   :  { %212 = vmatprep.subr.bf16.mxu0 %v288_v0 }
  0x1f   :  { %214 = vmatpush3.bf16.msra.mxu0 %v213_v10 }
  0x20   :  { %215 = vmatprep.subr.bf16.mxu0 %v288_v0 }
  0x23   :  { %217 = vmatpush3.bf16.msra.mxu0 %v216_v13 }
  0x24   :  { %218 = vmatprep.subr.bf16.mxu0 %v288_v0 }
  0x27   :  { %220 = vmatpush3.bf16.msra.mxu0 %v219_v16 }
  0x28   :  { %221 = vmatprep.subr.bf16.mxu0 %v288_v0 }
  0x2b   :  { %223 = vmatpush3.bf16.msra.mxu0 %v222_v19 }
  0x2c   :  { %224 = vmatprep.subr.bf16.mxu0 %v288_v0 }
  0x2f   :  { %226 = vmatpush3.bf16.msra.mxu0 %v225_v22 }
  0x30   :  { %227 = vmatprep.subr.bf16.mxu0 %v288_v0 }
  0x33   :  { %229 = vmatpush3.bf16.msra.mxu0 %v228_v25 }
  0x36   :  { %204 = vmatmul.mubr.f32.vlgmr.msra.gmra.mrb[0].mxu0 %v35_v26 }
 0x109   :  { %v118_v28 = vpop.f32.mrb[0].mxu0 }
 0x10a   :  { %v135_v29 = vadd.f32 %v153_v27, %v118_v28  ;;  %v205_v30 = vpop.f32.mrb[1].mxu0 }
 0x10c   :  { %v136_v31 = vmax.f32 %v135_v29, 0.0 }
 0x10e   :  { %137 = vst [vmem:[#allocation6] sm:$0xff] %v136_v31 }
 0x10f   :  { %270 = shalt.err (!%p267_p12)
}
 0x110   :  { %s271_s6 = scalar_lea.hbm %s345_s3, 128 }
 0x111   :  { %p272_p13 = scmp.ne.s32.totalorder %s345_s3, %s271_s6  ;;  %p275_p0 = scmp.lt.u32.totalorder %s271_s6, %s345_s3 }
 0x113   :  { %p277_p1 = pnand %p275_p0, %p272_p13 }
 0x115   :  { %280 = shalt.err (!%p277_p1)
}
 0x116   :  { %147 = dma.vmem_to_hbm [thread:$0]  %s145_s30, 128, %s345_s3, [#allocation5]  }
 0x117   :  { %283 = dma.done.wait [#allocation5], 128  }
 0x118   :  { %284 = vsyncadd [#allocation5], 4294967168 }
 0x119   :  { %151 = vsyncpa [#allocation4], 1 }
 0x11a   :  { %152 = vsyncpa [#allocation5], 1 }

</bundles_post_ra>
